<compile_context>
chip_gen: v6e
topology: v6e:2x2x1
jax: 0.10.0
libtpu: 0.0.40
codegen_flags: <defaults>
</compile_context>

<pallas_src>
import functools
import math

import jax
import jax.numpy as jnp
import numpy as np
from jax.experimental import pallas as pl
from jax.experimental.pallas import tpu as pltpu

_FILTER = 0.75
_MAGNIFY = 1.25


def _round_up(x, m):
    return (x + m - 1) // m * m


def _cdiv(a, b):
    return (a + b - 1) // b


def _pick_row_tile(total_rows, bytes_per_row, target_bytes):
    """Rows per block: multiple of 8 (or the full extent), >= 2 grid steps when possible."""
    if total_rows <= 8:
        return max(total_rows, 1)
    tile = max(8, min(target_bytes // bytes_per_row, total_rows) // 8 * 8)
    if total_rows >= 16 and _cdiv(total_rows, tile) < 2:
        tile = max(8, (total_rows // 2) // 8 * 8)
    return tile


def _rank_kernel_groups(x_ref, o_ref, *, c, top_k, filter_value, magnify_value):
    """Narrow-C kernel.  Block (sub, width): each row holds width // c independent channel
    groups of c consecutive lanes (lane-dense layout of the flattened (rows, c) input)."""
    x = x_ref[...].astype(jnp.float32)
    width = x.shape[-1]
    pos = jax.lax.broadcasted_iota(jnp.int32, x.shape, 1) % c
    gt = jnp.zeros(x.shape, jnp.float32)
    # Count, per element, how many members of its own c-group are strictly greater.
    # jnp.roll(x, s)[i] == x[(i - s) % width], so:
    #   roll(x, width - d) -> value at lane i + d       (same group when pos < c - d)
    #   roll(x, c - d)     -> value at lane i + d - c   (cyclic wrap inside the group)
    for d in range(1, c):
        fwd = jnp.roll(x, width - d, axis=1)
        wrap = jnp.roll(x, c - d, axis=1)
        other = jnp.where(pos < c - d, fwd, wrap)
        gt = gt + (other > x)
    # x >= (top_k-th largest of its group)  <=>  fewer than top_k strictly-greater members.
    scale = jnp.where(gt < float(top_k), jnp.float32(magnify_value),
                      jnp.float32(filter_value))
    o_ref[...] = (x * scale).astype(o_ref.dtype)


def _rank_kernel_radix(x_ref, o_ref, *, top_k, filter_value, magnify_value):
    """Wide-C kernel.  Block (row_tile, C), rows on sublanes.  Bitwise (radix) top-k
    threshold selection along the lane axis: 32 passes independent of C, no sort/rolls."""
    x = x_ref[...].astype(jnp.float32)
    rows = x.shape[0]
    # Monotone, order-preserving integer key (offset-binary bit pattern of the f32).
    xz = jnp.where(x == 0.0, jnp.float32(0.0), x)          # canonicalize -0.0
    bits = jax.lax.bitcast_convert_type(xz, jnp.int32)
    u = jnp.where(bits >= 0, bits ^ jnp.int32(-2 ** 31), ~bits)

    prefix = jnp.full(x.shape, True)          # still matches the threshold's bit prefix
    above = jnp.full(x.shape, False)          # already known to be > threshold
    count_above = jnp.zeros((rows, 1), jnp.float32)
    k_f = jnp.float32(top_k)
    for b in range(31, -1, -1):
        bit1 = ((u >> b) & 1) == 1
        cand = jnp.logical_and(prefix, bit1)
        c1 = jnp.sum(cand.astype(jnp.float32), axis=-1, keepdims=True)
        take = (count_above + c1) >= k_f                   # threshold has this bit set
        above = jnp.logical_or(above, jnp.logical_and(cand, jnp.logical_not(take)))
        prefix = jnp.where(take, cand, jnp.logical_and(prefix, jnp.logical_not(bit1)))
        count_above = jnp.where(take, count_above, count_above + c1)
    keep = jnp.logical_or(above, prefix)                   # x >= top_k-th largest of row
    scale = jnp.where(keep, jnp.float32(magnify_value), jnp.float32(filter_value))
    o_ref[...] = (x * scale).astype(o_ref.dtype)


def _rank_forward_impl(y):
    c = int(y.shape[1])
    top_k = max(c // 2, 1)               # torch.topk requires k >= 1
    pred = y.reshape(-1, c)              # same reinterpretation as torch .view(-1, C)
    rows = int(pred.shape[0])
    dtype = pred.dtype
    itemsize = jnp.dtype(dtype).itemsize

    compiler_params = pltpu.CompilerParams(
        dimension_semantics=("parallel",),
        vmem_limit_bytes=32 * 1024 * 1024,
    )

    if c < 128:
        # Lane-dense layout with zero host transposes: flatten row-major so every channel
        # group is c consecutive lanes; width is a multiple of both c and 128.
        width = math.lcm(c, 128)
        total = rows * c
        flat = pred.reshape(total)
        total_p = _round_up(total, width)
        if total_p != total:  # rare: pad a few garbage groups; sliced off below
            flat = jnp.pad(flat, (0, total_p - total))
        n = total_p // width
        x2 = flat.reshape(n, width)
        sub = _pick_row_tile(n, width * max(itemsize, 4), 1 << 20)  # ~1 MiB f32 blocks
        grid = (_cdiv(n, sub),)
        kernel = functools.partial(
            _rank_kernel_groups, c=c, top_k=top_k,
            filter_value=_FILTER, magnify_value=_MAGNIFY)
        cost = pl.CostEstimate(
            flops=4 * total_p * max(c - 1, 1),
            transcendentals=0,
            bytes_accessed=2 * total_p * itemsize)
        out2 = pl.pallas_call(
            kernel,
            out_shape=jax.ShapeDtypeStruct((n, width), dtype),
            grid=grid,
            in_specs=[pl.BlockSpec((sub, width), lambda i: (i, 0))],
            out_specs=pl.BlockSpec((sub, width), lambda i: (i, 0)),
            compiler_params=compiler_params,
            cost_estimate=cost,
        )(x2)
        out_flat = out2.reshape(total_p)
        if total_p != total:
            out_flat = out_flat[:total]
        return out_flat.reshape(rows, c)

    # c >= 128: natural (rows, c) layout, 32-pass radix threshold select per row.
    row_tile = _pick_row_tile(rows, c * max(itemsize, 4), 128 * 1024)  # ~128 KiB blocks
    grid = (_cdiv(rows, row_tile),)
    kernel = functools.partial(
        _rank_kernel_radix, top_k=top_k,
        filter_value=_FILTER, magnify_value=_MAGNIFY)
    cost = pl.CostEstimate(
        flops=rows * c * 32 * 8,
        transcendentals=0,
        bytes_accessed=2 * rows * c * itemsize)
    return pl.pallas_call(
        kernel,
        out_shape=jax.ShapeDtypeStruct((rows, c), dtype),
        grid=grid,
        in_specs=[pl.BlockSpec((row_tile, c), lambda i: (i, 0))],
        out_specs=pl.BlockSpec((row_tile, c), lambda i: (i, 0)),
        compiler_params=compiler_params,
        cost_estimate=cost,
    )(pred)


# Jit the whole forward so the flatten/reshape plumbing around the kernel is free
# (bitcasts) instead of extra HBM passes.
rank_forward = jax.jit(_rank_forward_impl)


def _reference(y, filter_value=_FILTER, magnify_value=_MAGNIFY):
    c = y.shape[1]
    top_k = max(c // 2, 1)
    pred = y.reshape(-1, c)
    t = jnp.sort(pred, axis=1)[:, c - top_k][:, None]  # top_k-th largest per row
    return jnp.where(pred < t, filter_value * pred, magnify_value * pred)


if __name__ == "__main__":
    key_small, key_wide = jax.random.split(jax.random.PRNGKey(0))

    # Small NCHW input consistent with the module: batch=2, channels=4, spatial=16.
    x = jax.random.normal(key_small, (2, 4, 16, 16), dtype=jnp.float32)
    out = jax.block_until_ready(rank_forward(x))
    np.testing.assert_allclose(np.asarray(out), np.asarray(_reference(x)),
                               rtol=1e-6, atol=1e-6)

    # Also exercise the wide (C >= 128) radix-select path.
    x_wide = jax.random.normal(key_wide, (2, 128, 4, 4), dtype=jnp.float32)
    out_wide = jax.block_until_ready(rank_forward(x_wide))
    np.testing.assert_allclose(np.asarray(out_wide), np.asarray(_reference(x_wide)),
                               rtol=1e-6, atol=1e-6)

    print("KERNEL_OK")
</pallas_src>

<mosaic_0001>
module attributes {stable_mosaic.version = 11 : i64} {
  func.func @_rank_kernel_groups(%arg0: i32, %arg1: memref<8x128xf32, #tpu.memory_space<vmem>>, %arg2: memref<8x128xf32, #tpu.memory_space<vmem>>) attributes {dimension_semantics = [#tpu.dimension_semantics<parallel>], iteration_bounds = array<i64: 2>, scalar_prefetch = 0 : i64, scratch_operands = 0 : i64, tpu.core_type = #tpu.core_type<tc>, window_params = [{transform_indices = @transform_0, window_bounds = array<i64: 8, 128>}, {transform_indices = @transform_1, window_bounds = array<i64: 8, 128>}]} {
    %c0 = arith.constant 0 : index
    %c0_0 = arith.constant 0 : index
    %0 = vector.load %arg1[%c0, %c0_0] : memref<8x128xf32, #tpu.memory_space<vmem>>, vector<8x128xf32>
    %1 = tpu.iota {dimensions = array<i32: 1>} : vector<8x128xi32>
    %c4_i32 = arith.constant 4 : i32
    %c0_i32 = arith.constant 0 : i32
    %2 = arith.cmpi eq, %c4_i32, %c0_i32 : i32
    %c1_i32 = arith.constant 1 : i32
    %3 = arith.select %2, %c1_i32, %c4_i32 : i32
    %4 = vector.broadcast %3 : i32 to vector<8x128xi32>
    %5 = arith.remsi %1, %4 : vector<8x128xi32>
    %c0_i32_1 = arith.constant 0 : i32
    %6 = vector.broadcast %c0_i32_1 : i32 to vector<8x128xi32>
    %7 = arith.cmpi ne, %5, %6 : vector<8x128xi32>
    %c0_i32_2 = arith.constant 0 : i32
    %8 = vector.broadcast %c0_i32_2 : i32 to vector<8x128xi32>
    %9 = arith.cmpi slt, %5, %8 : vector<8x128xi32>
    %c0_i32_3 = arith.constant 0 : i32
    %10 = arith.cmpi slt, %3, %c0_i32_3 : i32
    %11 = vector.broadcast %10 : i1 to vector<8x128xi1>
    %12 = vector.broadcast %11 : vector<8x128xi1> to vector<8x128xi1>
    %13 = arith.xori %9, %12 : vector<8x128xi1>
    %14 = arith.andi %13, %7 : vector<8x128xi1>
    %15 = vector.broadcast %3 : i32 to vector<8x128xi32>
    %16 = arith.addi %5, %15 : vector<8x128xi32>
    %17 = arith.select %14, %16, %5 : vector<8x128xi1>, vector<8x128xi32>
    %cst = arith.constant 0.000000e+00 : f32
    %18 = vector.broadcast %cst : f32 to vector<8x128xf32>
    %19 = vector.extract_strided_slice %0 {offsets = [0, 1], sizes = [8, 127], strides = [1, 1]} : vector<8x128xf32> to vector<8x127xf32>
    %20 = vector.extract_strided_slice %0 {offsets = [0, 0], sizes = [8, 1], strides = [1, 1]} : vector<8x128xf32> to vector<8x1xf32>
    %21 = tpu.concatenate %19, %20 in 1 : vector<8x127xf32>, vector<8x1xf32> -> vector<8x128xf32>
    %22 = vector.extract_strided_slice %0 {offsets = [0, 125], sizes = [8, 3], strides = [1, 1]} : vector<8x128xf32> to vector<8x3xf32>
    %23 = vector.extract_strided_slice %0 {offsets = [0, 0], sizes = [8, 125], strides = [1, 1]} : vector<8x128xf32> to vector<8x125xf32>
    %24 = tpu.concatenate %22, %23 in 1 : vector<8x3xf32>, vector<8x125xf32> -> vector<8x128xf32>
    %c3_i32 = arith.constant 3 : i32
    %25 = vector.broadcast %c3_i32 : i32 to vector<8x128xi32>
    %26 = arith.cmpi slt, %17, %25 : vector<8x128xi32>
    %27 = arith.select %26, %21, %24 : vector<8x128xi1>, vector<8x128xf32>
    %28 = arith.cmpf ogt, %27, %0 : vector<8x128xf32>
    %29 = arith.extui %28 : vector<8x128xi1> to vector<8x128xi32>
    %30 = arith.sitofp %29 : vector<8x128xi32> to vector<8x128xf32>
    %31 = arith.addf %18, %30 : vector<8x128xf32>
    %32 = vector.extract_strided_slice %0 {offsets = [0, 2], sizes = [8, 126], strides = [1, 1]} : vector<8x128xf32> to vector<8x126xf32>
    %33 = vector.extract_strided_slice %0 {offsets = [0, 0], sizes = [8, 2], strides = [1, 1]} : vector<8x128xf32> to vector<8x2xf32>
    %34 = tpu.concatenate %32, %33 in 1 : vector<8x126xf32>, vector<8x2xf32> -> vector<8x128xf32>
    %35 = vector.extract_strided_slice %0 {offsets = [0, 126], sizes = [8, 2], strides = [1, 1]} : vector<8x128xf32> to vector<8x2xf32>
    %36 = vector.extract_strided_slice %0 {offsets = [0, 0], sizes = [8, 126], strides = [1, 1]} : vector<8x128xf32> to vector<8x126xf32>
    %37 = tpu.concatenate %35, %36 in 1 : vector<8x2xf32>, vector<8x126xf32> -> vector<8x128xf32>
    %c2_i32 = arith.constant 2 : i32
    %38 = vector.broadcast %c2_i32 : i32 to vector<8x128xi32>
    %39 = arith.cmpi slt, %17, %38 : vector<8x128xi32>
    %40 = arith.select %39, %34, %37 : vector<8x128xi1>, vector<8x128xf32>
    %41 = arith.cmpf ogt, %40, %0 : vector<8x128xf32>
    %42 = arith.extui %41 : vector<8x128xi1> to vector<8x128xi32>
    %43 = arith.sitofp %42 : vector<8x128xi32> to vector<8x128xf32>
    %44 = arith.addf %31, %43 : vector<8x128xf32>
    %45 = vector.extract_strided_slice %0 {offsets = [0, 3], sizes = [8, 125], strides = [1, 1]} : vector<8x128xf32> to vector<8x125xf32>
    %46 = vector.extract_strided_slice %0 {offsets = [0, 0], sizes = [8, 3], strides = [1, 1]} : vector<8x128xf32> to vector<8x3xf32>
    %47 = tpu.concatenate %45, %46 in 1 : vector<8x125xf32>, vector<8x3xf32> -> vector<8x128xf32>
    %48 = vector.extract_strided_slice %0 {offsets = [0, 127], sizes = [8, 1], strides = [1, 1]} : vector<8x128xf32> to vector<8x1xf32>
    %49 = vector.extract_strided_slice %0 {offsets = [0, 0], sizes = [8, 127], strides = [1, 1]} : vector<8x128xf32> to vector<8x127xf32>
    %50 = tpu.concatenate %48, %49 in 1 : vector<8x1xf32>, vector<8x127xf32> -> vector<8x128xf32>
    %c1_i32_4 = arith.constant 1 : i32
    %51 = vector.broadcast %c1_i32_4 : i32 to vector<8x128xi32>
    %52 = arith.cmpi slt, %17, %51 : vector<8x128xi32>
    %53 = arith.select %52, %47, %50 : vector<8x128xi1>, vector<8x128xf32>
    %54 = arith.cmpf ogt, %53, %0 : vector<8x128xf32>
    %55 = arith.extui %54 : vector<8x128xi1> to vector<8x128xi32>
    %56 = arith.sitofp %55 : vector<8x128xi32> to vector<8x128xf32>
    %57 = arith.addf %44, %56 : vector<8x128xf32>
    %cst_5 = arith.constant 2.000000e+00 : f32
    %58 = vector.broadcast %cst_5 : f32 to vector<8x128xf32>
    %59 = arith.cmpf olt, %57, %58 : vector<8x128xf32>
    %cst_6 = arith.constant 1.250000e+00 : f32
    %cst_7 = arith.constant 7.500000e-01 : f32
    %60 = vector.broadcast %cst_6 : f32 to vector<8x128xf32>
    %61 = vector.broadcast %cst_7 : f32 to vector<8x128xf32>
    %62 = arith.select %59, %60, %61 : vector<8x128xi1>, vector<8x128xf32>
    %63 = arith.mulf %0, %62 : vector<8x128xf32>
    %c0_8 = arith.constant 0 : index
    %c0_9 = arith.constant 0 : index
    %64 = vector.load %arg2[%c0_8, %c0_9] : memref<8x128xf32, #tpu.memory_space<vmem>>, vector<8x128xf32>
    tpu.vector_store %arg2[%c0_8, %c0_9], %63 {strides = array<i32>} : memref<8x128xf32, #tpu.memory_space<vmem>>, vector<8x128xf32>,
    return
  }
  func.func @transform_0(%arg0: i32) -> (i32, i32) {
    %c0_i32 = arith.constant 0 : i32
    %c0_i32_0 = arith.constant 0 : i32
    return %arg0, %c0_i32 : i32, i32
  }
  func.func @transform_1(%arg0: i32) -> (i32, i32) {
    %c0_i32 = arith.constant 0 : i32
    %c0_i32_0 = arith.constant 0 : i32
    return %arg0, %c0_i32 : i32, i32
  }
}

</mosaic_0001>

<bundles_post_ra>
// kernel: _rank_forward_impl.1
= control target key start
LH: loop header
LB: loop body
LE: loop exit
PB: predicated region body
PF: predicated region fallthrough
CT: control target
= control target key end

     0   :  { %s275_s6 = smov 0   ;;  %s299_s0 = inlined_call_operand.vmem [shape: f32[16,128], index: 0, kind: input, shape index: {}]   ;;  %s300_s1 = inlined_call_operand.vmem [shape: f32[16,128], index: 1, kind: output, shape index: {}]  }
   0x1 LB: > { %s221_s7 = sadd.s32 4294967295, %s255_s6   ;;  %p225_p0 = scmp.ge.s32.totalorder %s255_s6, 1  ;;  %s255_s6 = sphi %s275_s6, %s11_s6  }
   0x2   : > { %p86_p1 = scmp.lt.s32.totalorder %s255_s6, 3 }
   0x4   : > { %p87_p2 = pnand %p225_p0, %p86_p1 }
   0x5   : > { %p104_p3 = scmp.lt.s32.totalorder (!%p87_p2), %s221_s7, 1  ;;  %s257_s12 = smov (!%p87_p2), 126  }
   0x6   : > { %90 = sbr.rel (%p87_p2) target bundleno = 148 (0x94), region = 24  ;;  %s258_s13 = smov (!%p87_p2), 127  }
   0x7   : > { %s259_s14 = smov (!%p87_p2), 2   ;;  %s260_s15 = smov (!%p87_p2), 3  }
   0x8   : > { %s261_s16 = smov (!%p87_p2), 1   ;;  %s262_s17 = smov (!%p87_p2), 125  }
   0xb   : > { %s302_s7 = smov (!%p104_p3, %s221_s7), 1  ;;  %v113_v1 = vlaneseq  ;;  %v263_v10 = vmov 0.0   ;;  %v264_v19 = vmov 0.75  }
   0xc   : > { %s226_s8 = sshll.u32 %s302_s7, 3 }
   0xd   : > { %s107_s11 = scalar_lea.vmem %s299_s0, %s226_s8  ;;  %v114_v2 = vand.u32 127, %v113_v1  ;;  %s111_s20 = scalar_lea.vmem %s300_s1, %s226_s8 }
   0xe   : > { %v112_v0 = vld [vmem:[%s107_s11] sm:$0xff] }
   0xf   : > { %140 = vrot.lane.b32.xlu1 %v112_v0, %s257_s12  ;;  %128 = vrot.lane.b32.xlu0 %v112_v0, %s258_s13  ;;  %v119_v3 = vand.u32 3, %v114_v2 }
  0x11   : > { %vm146_vm0 = vcmp.lt.s32.totalorder %v119_v3, 2  ;;  %vm134_vm1 = vcmp.lt.s32.totalorder %v119_v3, 3  ;;  %vm158_vm4 = vcmp.lt.s32.totalorder %v119_v3, 1 }
  0x13   : > { %143 = vrot.lane.b32.xlu1 %v112_v0, %s259_s14  ;;  %131 = vrot.lane.b32.xlu0 %v112_v0, %s260_s15 }
  0x17   : > { %155 = vrot.lane.b32.xlu1 %v112_v0, %s261_s16  ;;  %152 = vrot.lane.b32.xlu0 %v112_v0, %s262_s17 }
  0x81   : > { %v141_v4 = vpop.permute.xlu1 %140  ;;  %v129_v5 = vpop.permute.xlu0 %128 }
  0x85   : > { %v144_v6 = vpop.permute.xlu1 %143  ;;  %v132_v7 = vpop.permute.xlu0 %131 }
  0x86   : > { %v147_v8 = vsel %vm146_vm0, %v141_v4, %v144_v6  ;;  %v135_v9 = vsel %vm134_vm1, %v129_v5, %v132_v7 }
  0x87   : > { %vm148_vm2 = vcmp.gt.f32.partialorder %v147_v8, %v112_v0  ;;  %vm136_vm3 = vcmp.gt.f32.partialorder %v135_v9, %v112_v0 }
  0x88   : > { %v229_v11 = vsel %vm148_vm2, 1.0, %v263_v10  ;;  %v228_v12 = vsel %vm136_vm3, 1.0, %v263_v10 }
  0x89   : > { %v156_v13 = vpop.permute.xlu1 %155  ;;  %v153_v14 = vpop.permute.xlu0 %152  ;;  %v151_v16 = vadd.f32 %v229_v11, %v228_v12 }
  0x8a   : > { %v159_v15 = vsel %vm158_vm4, %v153_v14, %v156_v13 }
  0x8b   : > { %vm160_vm5 = vcmp.gt.f32.partialorder %v159_v15, %v112_v0 }
  0x8c   : > { %v230_v17 = vsel %vm160_vm5, 1.0, %v263_v10 }
  0x8d   : > { %v163_v18 = vadd.f32 %v230_v17, %v151_v16 }
  0x8f   : > { %vm164_vm6 = vcmp.lt.f32.partialorder %v163_v18, 2.0 }
  0x90   : > { %v165_v20 = vsel %vm164_vm6, 1.25, %v264_v19 }
  0x91   : > { %v166_v21 = vmul.f32 %v165_v20, %v112_v0 }
  0x93   : > { %167 = vst [vmem:[%s111_s20] sm:$0xff] %v166_v21 }
  0x94 PF: > { %s11_s6 = sadd.s32 1, %s255_s6  }
  0x95   : > { %p8_p4 = scmp.ge.s32.totalorder %s11_s6, 4  }
  0x97   :  { %10 = sbr.rel (!%p8_p4) target bundleno = 1 (0x1), region = 54 }

</bundles_post_ra>
